<compile_context>
chip_gen: v5e
topology: v5e:2x2
jax: 0.10.0
libtpu: 0.0.40
codegen_flags: <defaults>
</compile_context>

<pallas_src>
import functools

import jax
import jax.numpy as jnp
import numpy as np
from jax import lax
from jax.experimental import pallas as pl
from jax.experimental.pallas import tpu as pltpu

_MASK_VALUE_F32 = -1e9   # get_mask_value() for float32 (scores are f32 here)
_LN_EPS = 1e-5
_MiB = 1024 * 1024


def _leaky_relu(x, slope=0.01):
    return jnp.where(x >= 0, x, slope * x)


def _round_up(x, m):
    return (x + m - 1) // m * m


def _choose_batch_block(B, F):
    """Largest divisor Bb of B s.t. Bb*F rows per matmul and beta stays small."""
    if F % 8 != 0:
        return 1
    for cand in range(min(B, 64), 0, -1):
        if B % cand == 0 and cand * F <= 1024 and cand * F * F * 4 <= 4 * _MiB:
            return cand
    return 1


def _vmem_limit(est_bytes):
    # Leave headroom below v7x's 64 MiB physical VMEM; never request < 16 MiB.
    return int(min(48 * _MiB, max(16 * _MiB, 2 * est_bytes + 2 * _MiB)))


# ---------------------------------------------------------------------------
# Kernel 1: batched topology attention + output-projection fold
#           (grid over batch blocks)
# ---------------------------------------------------------------------------
def _topo_attn_kernel(t_ref, adj_ref, wtp_ref, btp_ref, rows_ref, const_ref,
                      wop_ref, tw_ref, t2c_ref, *, matmul_dtype):
    Bb, F, Ft = t_ref.shape
    Hd = wtp_ref.shape[1]
    O = wop_ref.shape[1]

    # topo_proj: one [Bb*F, Ft] matmul instead of Bb tiny ones
    t_flat = t_ref[...].reshape(Bb * F, Ft).astype(matmul_dtype)
    tp = jnp.dot(t_flat, wtp_ref[...].astype(matmul_dtype),
                 preferred_element_type=jnp.float32)
    tp = (tp + btp_ref[...]).reshape(Bb, F, Hd)                 # f32 [Bb,F,Hd]

    at1 = rows_ref[0:1, :]                                      # [1, Hd]
    at2 = rows_ref[1:2, :]
    af2 = rows_ref[2:3, :]
    bta = const_ref[0:1, 0:1]                                   # [1, 1]
    cf = const_ref[0:1, 1:2]

    # width-1 "matmuls" done on VPU (mul) + XLU (lane reduce), not the MXU
    s1 = jnp.sum(tp * at1, axis=-1, keepdims=True) + bta        # [Bb, F, 1]
    s2 = jnp.sum(tp * at2, axis=-1)                             # [Bb, F]
    e = _leaky_relu(s1 + s2[:, None, :])                        # [Bb, F, F]
    e = jnp.where(adj_ref[...][None, :, :] == 0.0, _MASK_VALUE_F32, e)

    m = jnp.max(e, axis=-1, keepdims=True)
    p = jnp.exp(e - m)
    beta = p * pl.reciprocal(jnp.sum(p, axis=-1, keepdims=True), approx=True)

    t_out = jnp.einsum('bij,bjh->bih', beta.astype(matmul_dtype),
                       tp.astype(matmul_dtype),
                       preferred_element_type=jnp.float32)      # [Bb, F, Hd]

    # Associativity fold: TW = T_out @ W_op^T, computed once per batch
    tw = jnp.dot(t_out.reshape(Bb * F, Hd).astype(matmul_dtype),
                 wop_ref[...].astype(matmul_dtype),
                 preferred_element_type=jnp.float32).reshape(Bb, F, O)
    tw_ref[...] = tw.astype(tw_ref.dtype)

    # Hoisted node-attention term  t2c[b, f] = a_f2 · T_out[b, f] + cf
    t2c = jnp.sum(t_out * af2, axis=-1) + cf                    # [Bb, F]
    t2c_ref[...] = t2c[:, None, :].astype(t2c_ref.dtype)


# ---------------------------------------------------------------------------
# Kernel 2: row-tiled node attention + residual + bias + LayerNorm
#           (grid over (B, N tiles))
# ---------------------------------------------------------------------------
def _node_attn_kernel(x_ref, t2c_ref, tw_ref, wfa1_ref, *rest,
                      has_rproj, matmul_dtype):
    if has_rproj:
        wrp_ref, vecs_ref, o_ref = rest
    else:
        vecs_ref, o_ref = rest

    x = x_ref[0]                                                # [tn, F]
    xf = x.astype(jnp.float32)

    # feature-attention logits (feature_proj folded into wfa1 / t2c)
    h1 = jnp.sum(xf * wfa1_ref[...], axis=-1, keepdims=True)    # [tn, 1]
    e = _leaky_relu(h1 + t2c_ref[0])                            # [tn, F]
    m = jnp.max(e, axis=-1, keepdims=True)
    p = jnp.exp(e - m)
    alpha = p * pl.reciprocal(jnp.sum(p, axis=-1, keepdims=True), approx=True)

    # out = alpha @ (T_out @ W_op^T)  — single per-tile matmul
    out = jnp.dot(alpha.astype(matmul_dtype), tw_ref[0].astype(matmul_dtype),
                  preferred_element_type=jnp.float32)           # [tn, O]

    if has_rproj:
        out = out + jnp.dot(x.astype(matmul_dtype),
                            wrp_ref[...].astype(matmul_dtype),
                            preferred_element_type=jnp.float32)
    else:
        out = out + xf                                          # identity residual
    out = out + vecs_ref[0:1, :]                                # fused bias

    # LayerNorm over the last dim (dropout is identity in eval mode)
    mu = jnp.mean(out, axis=-1, keepdims=True)
    d = out - mu
    var = jnp.mean(d * d, axis=-1, keepdims=True)
    yn = d * lax.rsqrt(var + _LN_EPS)
    o_ref[0] = (yn * vecs_ref[1:2, :] + vecs_ref[2:3, :]).astype(o_ref.dtype)


# ---------------------------------------------------------------------------
# Wrapper
# ---------------------------------------------------------------------------
def gtat_wrapper_forward(x, adj, topo, params, *, tile_n=512,
                         matmul_dtype=jnp.float32):
    """x: [B,N,F], adj: [F,F], topo: [B,F,Ft]  ->  [B,N,O]."""
    B, N, F_dim = x.shape
    Ft = topo.shape[-1]
    Hd = params["W_fp"].shape[0]
    O = params["W_op"].shape[0]
    f32 = jnp.float32
    has_rproj = params.get("W_rp") is not None
    is_bf16 = jnp.dtype(matmul_dtype) == jnp.dtype(jnp.bfloat16)
    tw_dtype = jnp.bfloat16 if is_bf16 else f32

    # --- host-side parameter prep (transposes + algebraic folds; all tiny) ---
    wtp_t = params["W_tp"].T.astype(f32)                          # [Ft, Hd]
    btp = params["b_tp"].reshape(1, Hd).astype(f32)
    rows_hd = jnp.concatenate(
        [params["W_ta"][:, :Hd], params["W_ta"][:, Hd:],
         params["W_fa"][:, Hd:]], axis=0).astype(f32)             # [3, Hd]
    af1 = params["W_fa"][:, :Hd].astype(f32)                      # [1, Hd]
    cf = af1 @ params["b_fp"].reshape(Hd, 1).astype(f32) \
        + params["b_fa"].reshape(1, 1).astype(f32)                # [1, 1]
    const = jnp.concatenate(
        [params["b_ta"].reshape(1, 1).astype(f32), cf], axis=1)   # [1, 2]
    wfa1_row = (af1 @ params["W_fp"].astype(f32))                 # [1, F]
    wop_t = params["W_op"].T.astype(f32)                          # [Hd, O]

    if has_rproj:
        wrp_t = params["W_rp"].T.astype(f32)                      # [F, O]
        bias = (params["b_op"] + params["b_rp"]).reshape(1, O)
    else:
        assert F_dim == O, "identity residual needs input_size == output_size"
        wrp_t = None
        bias = params["b_op"].reshape(1, O)
    vecs = jnp.concatenate(
        [bias.astype(f32), params["gamma"].reshape(1, O).astype(f32),
         params["beta"].reshape(1, O).astype(f32)], axis=0)       # [3, O]

    # --- Kernel 1: batched topology attention, grid over batch blocks ---
    Bb = _choose_batch_block(B, F_dim)
    itw = jnp.dtype(tw_dtype).itemsize
    est1 = (2 * (Bb * F_dim * Ft * topo.dtype.itemsize + F_dim * F_dim * 4
                 + Ft * Hd * 4 + 4 * Hd * 4 + 8 + Hd * O * 4
                 + Bb * F_dim * O * itw + Bb * F_dim * 4)
            + 4 * Bb * F_dim * F_dim * 4 + 4 * Bb * F_dim * Hd * 4)

    tw, t2c = pl.pallas_call(
        functools.partial(_topo_attn_kernel, matmul_dtype=matmul_dtype),
        out_shape=(jax.ShapeDtypeStruct((B, F_dim, O), tw_dtype),
                   jax.ShapeDtypeStruct((B, 1, F_dim), f32)),
        grid=(B // Bb,),
        in_specs=[
            pl.BlockSpec((Bb, F_dim, Ft), lambda g: (g, 0, 0)),
            pl.BlockSpec((F_dim, F_dim), lambda g: (0, 0)),
            pl.BlockSpec((Ft, Hd), lambda g: (0, 0)),
            pl.BlockSpec((1, Hd), lambda g: (0, 0)),
            pl.BlockSpec((3, Hd), lambda g: (0, 0)),
            pl.BlockSpec((1, 2), lambda g: (0, 0)),
            pl.BlockSpec((Hd, O), lambda g: (0, 0)),
        ],
        out_specs=(pl.BlockSpec((Bb, F_dim, O), lambda g: (g, 0, 0)),
                   pl.BlockSpec((Bb, 1, F_dim), lambda g: (g, 0, 0))),
        compiler_params=pltpu.CompilerParams(
            dimension_semantics=("parallel",),
            vmem_limit_bytes=_vmem_limit(est1)),
    )(topo, adj.astype(f32), wtp_t, btp, rows_hd, const, wop_t)

    # --- Kernel 2: fused node attention + residual + bias + LayerNorm ---
    gran = 8 if x.dtype.itemsize >= 4 else 16
    tn = N if N <= tile_n else _round_up(tile_n, gran)

    def _est2(t):
        xb = x.dtype.itemsize
        return (2 * (t * F_dim * xb + F_dim * 4 + F_dim * O * itw + F_dim * 4
                     + (F_dim * O * 4 if has_rproj else 0) + 3 * O * 4
                     + t * O * xb)
                + 4 * t * F_dim * 4 + 3 * t * O * 4)

    while tn > gran and _est2(tn) > 40 * _MiB:
        tn = max(gran, _round_up(tn // 2, gran))
    n_tiles = pl.cdiv(N, tn)

    in_specs = [
        pl.BlockSpec((1, tn, F_dim), lambda b, n: (b, n, 0)),
        pl.BlockSpec((1, 1, F_dim), lambda b, n: (b, 0, 0)),
        pl.BlockSpec((1, F_dim, O), lambda b, n: (b, 0, 0)),
        pl.BlockSpec((1, F_dim), lambda b, n: (0, 0)),
    ]
    args = [x, t2c, tw, wfa1_row]
    if has_rproj:
        in_specs.append(pl.BlockSpec((F_dim, O), lambda b, n: (0, 0)))
        args.append(wrp_t)
    in_specs.append(pl.BlockSpec((3, O), lambda b, n: (0, 0)))
    args.append(vecs)

    out = pl.pallas_call(
        functools.partial(_node_attn_kernel, has_rproj=has_rproj,
                          matmul_dtype=matmul_dtype),
        out_shape=jax.ShapeDtypeStruct((B, N, O), x.dtype),
        grid=(B, n_tiles),
        in_specs=in_specs,
        out_specs=pl.BlockSpec((1, tn, O), lambda b, n: (b, n, 0)),
        compiler_params=pltpu.CompilerParams(
            dimension_semantics=("parallel", "parallel"),
            vmem_limit_bytes=_vmem_limit(_est2(tn))),
    )(*args)
    return out


# ---------------------------------------------------------------------------
# Pure-JAX reference (direct translation of the PyTorch module, eval mode)
# ---------------------------------------------------------------------------
def gtat_wrapper_ref(x, adj, topo, params):
    B, N, F_dim = x.shape
    Hd = params["W_fp"].shape[0]

    H_proj = x @ params["W_fp"].T + params["b_fp"]
    T_proj = topo @ params["W_tp"].T + params["b_tp"]

    Ti = jnp.broadcast_to(T_proj[:, :, None, :], (B, F_dim, F_dim, Hd))
    Tj = jnp.broadcast_to(T_proj[:, None, :, :], (B, F_dim, F_dim, Hd))
    topo_cat = jnp.concatenate([Ti, Tj], axis=-1)
    e_topo = (topo_cat @ params["W_ta"].T)[..., 0] + params["b_ta"][0]
    e_topo = _leaky_relu(e_topo)
    adj_b = jnp.broadcast_to(adj[None], (B, F_dim, F_dim))
    e_topo = jnp.where(adj_b == 0.0, _MASK_VALUE_F32, e_topo)
    beta = jax.nn.softmax(e_topo, axis=-1)
    T_out = beta @ T_proj

    He = jnp.broadcast_to(H_proj[:, :, None, :], (B, N, F_dim, Hd))
    Te = jnp.broadcast_to(T_out[:, None, :, :], (B, N, F_dim, Hd))
    feat_cat = jnp.concatenate([He, Te], axis=-1)
    e_feat = (feat_cat @ params["W_fa"].T)[..., 0] + params["b_fa"][0]
    e_feat = _leaky_relu(e_feat)
    alpha = jax.nn.softmax(e_feat, axis=-1)
    H_out = alpha @ T_out

    out = H_out @ params["W_op"].T + params["b_op"]
    if params.get("W_rp") is not None:
        out = out + (x @ params["W_rp"].T + params["b_rp"])
    elif x.shape[-1] == out.shape[-1]:
        out = out + x
    mu = out.mean(-1, keepdims=True)
    var = ((out - mu) ** 2).mean(-1, keepdims=True)
    out = (out - mu) / jnp.sqrt(var + _LN_EPS)
    return out * params["gamma"] + params["beta"]


def init_params(key, input_size, output_size, topo_dim, hidden_dim):
    """Deterministic PyTorch-Linear-style init."""
    ks = jax.random.split(key, 6)

    def lin(k, out_dim, in_dim):
        bound = 1.0 / float(np.sqrt(in_dim))
        kw, kb = jax.random.split(k)
        W = jax.random.uniform(kw, (out_dim, in_dim), minval=-bound,
                               maxval=bound, dtype=jnp.float32)
        b = jax.random.uniform(kb, (out_dim,), minval=-bound,
                               maxval=bound, dtype=jnp.float32)
        return W, b

    W_fp, b_fp = lin(ks[0], hidden_dim, input_size)
    W_tp, b_tp = lin(ks[1], hidden_dim, topo_dim)
    W_fa, b_fa = lin(ks[2], 1, 2 * hidden_dim)
    W_ta, b_ta = lin(ks[3], 1, 2 * hidden_dim)
    W_op, b_op = lin(ks[4], output_size, hidden_dim)
    if input_size != output_size:
        W_rp, b_rp = lin(ks[5], output_size, input_size)
    else:
        W_rp, b_rp = None, None
    return dict(W_fp=W_fp, b_fp=b_fp, W_tp=W_tp, b_tp=b_tp,
                W_fa=W_fa, b_fa=b_fa, W_ta=W_ta, b_ta=b_ta,
                W_op=W_op, b_op=b_op, W_rp=W_rp, b_rp=b_rp,
                gamma=jnp.ones((output_size,), jnp.float32),
                beta=jnp.zeros((output_size,), jnp.float32))


if __name__ == "__main__":
    # Small shapes consistent with the module:
    #   x: [B, N, input_size], graph (adj): [F, F] with F == input_size,
    #   topo_embedding: [B, F, topo_dim]
    B, N = 2, 8
    input_size = 16
    output_size = 32          # != input_size -> exercises residual_proj
    topo_dim = 8
    hidden_dim = 32

    key = jax.random.PRNGKey(0)
    k_p, k_x, k_t, k_a, k_p2 = jax.random.split(key, 5)

    params = init_params(k_p, input_size, output_size, topo_dim, hidden_dim)
    x = jax.random.normal(k_x, (B, N, input_size), dtype=jnp.float32)
    topo = jax.random.normal(k_t, (B, input_size, topo_dim), dtype=jnp.float32)
    adj = (jax.random.uniform(k_a, (input_size, input_size)) > 0.4).astype(jnp.float32)

    ref = gtat_wrapper_ref(x, adj, topo, params)

    # 1) default f32 MXU operands, residual-projection branch
    out = jax.block_until_ready(gtat_wrapper_forward(x, adj, topo, params))
    np.testing.assert_allclose(np.asarray(out), np.asarray(ref),
                               rtol=1e-2, atol=1e-2)

    # 2) bf16 MXU operands (v5e/v6e/v7x fast path) — loose numeric check
    out_bf = jax.block_until_ready(
        gtat_wrapper_forward(x, adj, topo, params, matmul_dtype=jnp.bfloat16))
    assert np.all(np.isfinite(np.asarray(out_bf)))
    assert float(np.max(np.abs(np.asarray(out_bf) - np.asarray(ref)))) < 0.25

    # 3) identity-residual branch (input_size == output_size)
    params2 = init_params(k_p2, output_size, output_size, topo_dim, hidden_dim)
    x2 = jax.random.normal(k_x, (B, N, output_size), dtype=jnp.float32)
    topo2 = jax.random.normal(k_t, (B, output_size, topo_dim), dtype=jnp.float32)
    adj2 = (jax.random.uniform(k_a, (output_size, output_size)) > 0.4).astype(jnp.float32)
    out2 = jax.block_until_ready(gtat_wrapper_forward(x2, adj2, topo2, params2))
    ref2 = gtat_wrapper_ref(x2, adj2, topo2, params2)
    np.testing.assert_allclose(np.asarray(out2), np.asarray(ref2),
                               rtol=1e-2, atol=1e-2)

    # TODO(synk): training-mode nn.Dropout (stochastic mask) is not implemented;
    # forward pass here corresponds to eval mode (dropout = identity).
    print("KERNEL_OK")
</pallas_src>

<mosaic_0001>
module attributes {stable_mosaic.version = 11 : i64} {
  func.func @_topo_attn_kernel(%arg0: i32, %arg1: memref<2x16x8xf32, #tpu.memory_space<vmem>>, %arg2: memref<16x16xf32, #tpu.memory_space<vmem>>, %arg3: memref<8x32xf32, #tpu.memory_space<vmem>>, %arg4: memref<1x32xf32, #tpu.memory_space<vmem>>, %arg5: memref<3x32xf32, #tpu.memory_space<vmem>>, %arg6: memref<1x2xf32, #tpu.memory_space<vmem>>, %arg7: memref<32x32xf32, #tpu.memory_space<vmem>>, %arg8: memref<2x16x32xf32, #tpu.memory_space<vmem>>, %arg9: memref<2x1x16xf32, #tpu.memory_space<vmem>>) attributes {dimension_semantics = [#tpu.dimension_semantics<parallel>], iteration_bounds = array<i64: 1>, scalar_prefetch = 0 : i64, scratch_operands = 0 : i64, tpu.core_type = #tpu.core_type<tc>, window_params = [{transform_indices = @transform_0, window_bounds = array<i64: 2, 16, 8>}, {pipeline_mode = #tpu.pipeline_mode<synchronous>, transform_indices = @transform_1, window_bounds = array<i64: 16, 16>}, {pipeline_mode = #tpu.pipeline_mode<synchronous>, transform_indices = @transform_2, window_bounds = array<i64: 8, 32>}, {pipeline_mode = #tpu.pipeline_mode<synchronous>, transform_indices = @transform_3, window_bounds = array<i64: 1, 32>}, {pipeline_mode = #tpu.pipeline_mode<synchronous>, transform_indices = @transform_4, window_bounds = array<i64: 3, 32>}, {pipeline_mode = #tpu.pipeline_mode<synchronous>, transform_indices = @transform_5, window_bounds = array<i64: 1, 2>}, {pipeline_mode = #tpu.pipeline_mode<synchronous>, transform_indices = @transform_6, window_bounds = array<i64: 32, 32>}, {transform_indices = @transform_7, window_bounds = array<i64: 2, 16, 32>}, {transform_indices = @transform_8, window_bounds = array<i64: 2, 1, 16>}]} {
    %c0 = arith.constant 0 : index
    %c0_0 = arith.constant 0 : index
    %c0_1 = arith.constant 0 : index
    %0 = vector.load %arg1[%c0, %c0_0, %c0_1] : memref<2x16x8xf32, #tpu.memory_space<vmem>>, vector<2x16x8xf32>
    %1 = vector.shape_cast %0 : vector<2x16x8xf32> to vector<32x8xf32>
    %c0_2 = arith.constant 0 : index
    %c0_3 = arith.constant 0 : index
    %2 = vector.load %arg3[%c0_2, %c0_3] : memref<8x32xf32, #tpu.memory_space<vmem>>, vector<8x32xf32>
    %cst = arith.constant dense<0.000000e+00> : vector<32x32xf32>
    %3 = tpu.matmul %1, %2, %cst {dimension_numbers = #tpu.dot_dimension_numbers<[1], [0], [0], [1], [0, 0, 1, 1], [], []>} : vector<32x8xf32>, vector<8x32xf32>, vector<32x32xf32> -> vector<32x32xf32>
    %c0_4 = arith.constant 0 : index
    %c0_5 = arith.constant 0 : index
    %4 = vector.load %arg4[%c0_4, %c0_5] : memref<1x32xf32, #tpu.memory_space<vmem>>, vector<1x32xf32>
    %5 = vector.broadcast %4 : vector<1x32xf32> to vector<32x32xf32>
    %6 = arith.addf %3, %5 : vector<32x32xf32>
    %7 = vector.shape_cast %6 : vector<32x32xf32> to vector<2x16x32xf32>
    %c0_6 = arith.constant 0 : index
    %c0_7 = arith.constant 0 : index
    %8 = vector.load %arg5[%c0_6, %c0_7] : memref<3x32xf32, #tpu.memory_space<vmem>>, vector<1x32xf32>
    %c1 = arith.constant 1 : index
    %c0_8 = arith.constant 0 : index
    %9 = vector.load %arg5[%c1, %c0_8] : memref<3x32xf32, #tpu.memory_space<vmem>>, vector<1x32xf32>
    %c2 = arith.constant 2 : index
    %c0_9 = arith.constant 0 : index
    %10 = vector.load %arg5[%c2, %c0_9] : memref<3x32xf32, #tpu.memory_space<vmem>>, vector<1x32xf32>
    %c0_10 = arith.constant 0 : index
    %c0_11 = arith.constant 0 : index
    %11 = vector.load %arg6[%c0_10, %c0_11] : memref<1x2xf32, #tpu.memory_space<vmem>>, vector<1x1xf32>
    %c0_12 = arith.constant 0 : index
    %c1_13 = arith.constant 1 : index
    %12 = vector.load %arg6[%c0_12, %c1_13] : memref<1x2xf32, #tpu.memory_space<vmem>>, vector<1x1xf32>
    %13 = vector.shape_cast %8 : vector<1x32xf32> to vector<1x1x32xf32>
    %14 = vector.broadcast %13 : vector<1x1x32xf32> to vector<2x16x32xf32>
    %15 = arith.mulf %7, %14 : vector<2x16x32xf32>
    %cst_14 = arith.constant dense<0.000000e+00> : vector<2x16xf32>
    %16 = vector.multi_reduction <add>, %15, %cst_14 [2] : vector<2x16x32xf32> to vector<2x16xf32>
    %17 = vector.shape_cast %16 : vector<2x16xf32> to vector<2x16x1xf32>
    %18 = vector.shape_cast %11 : vector<1x1xf32> to vector<1x1x1xf32>
    %19 = vector.broadcast %18 : vector<1x1x1xf32> to vector<2x16x1xf32>
    %20 = arith.addf %17, %19 : vector<2x16x1xf32>
    %21 = vector.shape_cast %9 : vector<1x32xf32> to vector<1x1x32xf32>
    %22 = vector.broadcast %21 : vector<1x1x32xf32> to vector<2x16x32xf32>
    %23 = arith.mulf %7, %22 : vector<2x16x32xf32>
    %cst_15 = arith.constant dense<0.000000e+00> : vector<2x16xf32>
    %24 = vector.multi_reduction <add>, %23, %cst_15 [2] : vector<2x16x32xf32> to vector<2x16xf32>
    %25 = vector.shape_cast %24 : vector<2x16xf32> to vector<2x1x16xf32>
    %26 = vector.broadcast %20 : vector<2x16x1xf32> to vector<2x16x16xf32>
    %27 = vector.broadcast %25 : vector<2x1x16xf32> to vector<2x16x16xf32>
    %28 = arith.addf %26, %27 : vector<2x16x16xf32>
    %cst_16 = arith.constant 0.000000e+00 : f32
    %29 = vector.broadcast %cst_16 : f32 to vector<2x16x16xf32>
    %30 = arith.cmpf oge, %28, %29 : vector<2x16x16xf32>
    %cst_17 = arith.constant 0.00999999977 : f32
    %31 = vector.broadcast %cst_17 : f32 to vector<2x16x16xf32>
    %32 = arith.mulf %31, %28 : vector<2x16x16xf32>
    %33 = arith.select %30, %28, %32 : vector<2x16x16xi1>, vector<2x16x16xf32>
    %c0_18 = arith.constant 0 : index
    %c0_19 = arith.constant 0 : index
    %34 = vector.load %arg2[%c0_18, %c0_19] : memref<16x16xf32, #tpu.memory_space<vmem>>, vector<16x16xf32>
    %35 = vector.shape_cast %34 : vector<16x16xf32> to vector<1x16x16xf32>
    %cst_20 = arith.constant 0.000000e+00 : f32
    %36 = vector.broadcast %cst_20 : f32 to vector<1x16x16xf32>
    %37 = arith.cmpf oeq, %35, %36 : vector<1x16x16xf32>
    %cst_21 = arith.constant -1.000000e+09 : f32
    %38 = vector.shape_cast %37 : vector<1x16x16xi1> to vector<1x16x16xi1>
    %39 = vector.broadcast %38 : vector<1x16x16xi1> to vector<2x16x16xi1>
    %40 = vector.broadcast %cst_21 : f32 to vector<2x16x16xf32>
    %41 = arith.select %39, %40, %33 : vector<2x16x16xi1>, vector<2x16x16xf32>
    %cst_22 = arith.constant dense<0xFF800000> : vector<2x16xf32>
    %42 = vector.multi_reduction <maximumf>, %41, %cst_22 [2] : vector<2x16x16xf32> to vector<2x16xf32>
    %43 = vector.shape_cast %42 : vector<2x16xf32> to vector<2x16x1xf32>
    %44 = vector.broadcast %43 : vector<2x16x1xf32> to vector<2x16x16xf32>
    %45 = arith.subf %41, %44 : vector<2x16x16xf32>
    %46 = math.exp %45 : vector<2x16x16xf32>
    %cst_23 = arith.constant dense<0.000000e+00> : vector<2x16xf32>
    %47 = vector.multi_reduction <add>, %46, %cst_23 [2] : vector<2x16x16xf32> to vector<2x16xf32>
    %48 = vector.shape_cast %47 : vector<2x16xf32> to vector<2x16x1xf32>
    %49 = tpu.reciprocal %48 {approx = true} : vector<2x16x1xf32> -> vector<2x16x1xf32>
    %50 = vector.broadcast %49 : vector<2x16x1xf32> to vector<2x16x16xf32>
    %51 = arith.mulf %46, %50 : vector<2x16x16xf32>
    "tpu.trace_start"() <{level = 10 : i32, message = "bij,bjh->bih"}> : () -> ()
    %cst_24 = arith.constant dense<0.000000e+00> : vector<2x16x32xf32>
    %52 = tpu.matmul %51, %7, %cst_24 {dimension_numbers = #tpu.dot_dimension_numbers<[2], [1], [1], [2], [0, 0, 0, 1, 1, 2], [0], [0]>} : vector<2x16x16xf32>, vector<2x16x32xf32>, vector<2x16x32xf32> -> vector<2x16x32xf32>
    "tpu.trace_stop"() : () -> ()
    %53 = vector.shape_cast %52 : vector<2x16x32xf32> to vector<32x32xf32>
    %c0_25 = arith.constant 0 : index
    %c0_26 = arith.constant 0 : index
    %54 = vector.load %arg7[%c0_25, %c0_26] : memref<32x32xf32, #tpu.memory_space<vmem>>, vector<32x32xf32>
    %cst_27 = arith.constant dense<0.000000e+00> : vector<32x32xf32>
    %55 = tpu.matmul %53, %54, %cst_27 {dimension_numbers = #tpu.dot_dimension_numbers<[1], [0], [0], [1], [0, 0, 1, 1], [], []>} : vector<32x32xf32>, vector<32x32xf32>, vector<32x32xf32> -> vector<32x32xf32>
    %56 = vector.shape_cast %55 : vector<32x32xf32> to vector<2x16x32xf32>
    %c0_28 = arith.constant 0 : index
    %c0_29 = arith.constant 0 : index
    %c0_30 = arith.constant 0 : index
    %57 = vector.load %arg8[%c0_28, %c0_29, %c0_30] : memref<2x16x32xf32, #tpu.memory_space<vmem>>, vector<2x16x32xf32>
    tpu.vector_store %arg8[%c0_28, %c0_29, %c0_30], %56 {strides = array<i32>} : memref<2x16x32xf32, #tpu.memory_space<vmem>>, vector<2x16x32xf32>,
    %58 = vector.shape_cast %10 : vector<1x32xf32> to vector<1x1x32xf32>
    %59 = vector.broadcast %58 : vector<1x1x32xf32> to vector<2x16x32xf32>
    %60 = arith.mulf %52, %59 : vector<2x16x32xf32>
    %cst_31 = arith.constant dense<0.000000e+00> : vector<2x16xf32>
    %61 = vector.multi_reduction <add>, %60, %cst_31 [2] : vector<2x16x32xf32> to vector<2x16xf32>
    %62 = vector.broadcast %12 : vector<1x1xf32> to vector<2x16xf32>
    %63 = arith.addf %61, %62 : vector<2x16xf32>
    %64 = vector.shape_cast %63 : vector<2x16xf32> to vector<2x1x16xf32>
    %c0_32 = arith.constant 0 : index
    %c0_33 = arith.constant 0 : index
    %c0_34 = arith.constant 0 : index
    %65 = vector.load %arg9[%c0_32, %c0_33, %c0_34] : memref<2x1x16xf32, #tpu.memory_space<vmem>>, vector<2x1x16xf32>
    tpu.vector_store %arg9[%c0_32, %c0_33, %c0_34], %64 {strides = array<i32>} : memref<2x1x16xf32, #tpu.memory_space<vmem>>, vector<2x1x16xf32>,
    return
  }
  func.func @transform_0(%arg0: i32) -> (i32, i32, i32) {
    %c0_i32 = arith.constant 0 : i32
    %c0_i32_0 = arith.constant 0 : i32
    %c0_i32_1 = arith.constant 0 : i32
    return %arg0, %c0_i32, %c0_i32_0 : i32, i32, i32
  }
  func.func @transform_1(%arg0: i32) -> (i32, i32) {
    %c0_i32 = arith.constant 0 : i32
    %c0_i32_0 = arith.constant 0 : i32
    %c0_i32_1 = arith.constant 0 : i32
    return %c0_i32, %c0_i32_0 : i32, i32
  }
  func.func @transform_2(%arg0: i32) -> (i32, i32) {
    %c0_i32 = arith.constant 0 : i32
    %c0_i32_0 = arith.constant 0 : i32
    %c0_i32_1 = arith.constant 0 : i32
    return %c0_i32, %c0_i32_0 : i32, i32
  }
  func.func @transform_3(%arg0: i32) -> (i32, i32) {
    %c0_i32 = arith.constant 0 : i32
    %c0_i32_0 = arith.constant 0 : i32
    %c0_i32_1 = arith.constant 0 : i32
    return %c0_i32, %c0_i32_0 : i32, i32
  }
  func.func @transform_4(%arg0: i32) -> (i32, i32) {
    %c0_i32 = arith.constant 0 : i32
    %c0_i32_0 = arith.constant 0 : i32
    %c0_i32_1 = arith.constant 0 : i32
    return %c0_i32, %c0_i32_0 : i32, i32
  }
  func.func @transform_5(%arg0: i32) -> (i32, i32) {
    %c0_i32 = arith.constant 0 : i32
    %c0_i32_0 = arith.constant 0 : i32
    %c0_i32_1 = arith.constant 0 : i32
    return %c0_i32, %c0_i32_0 : i32, i32
  }
  func.func @transform_6(%arg0: i32) -> (i32, i32) {
    %c0_i32 = arith.constant 0 : i32
    %c0_i32_0 = arith.constant 0 : i32
    %c0_i32_1 = arith.constant 0 : i32
    return %c0_i32, %c0_i32_0 : i32, i32
  }
  func.func @transform_7(%arg0: i32) -> (i32, i32, i32) {
    %c0_i32 = arith.constant 0 : i32
    %c0_i32_0 = arith.constant 0 : i32
    %c0_i32_1 = arith.constant 0 : i32
    return %arg0, %c0_i32, %c0_i32_0 : i32, i32, i32
  }
  func.func @transform_8(%arg0: i32) -> (i32, i32, i32) {
    %c0_i32 = arith.constant 0 : i32
    %c0_i32_0 = arith.constant 0 : i32
    %c0_i32_1 = arith.constant 0 : i32
    return %arg0, %c0_i32, %c0_i32_0 : i32, i32, i32
  }
}

</mosaic_0001>

<bundles_post_ra>
// kernel: tpu_custom_call.1
= control target key start
LH: loop header
LB: loop body
LE: loop exit
PB: predicated region body
PF: predicated region fallthrough
CT: control target
= control target key end

     0   :  { %14 = vsyncpa [#allocation3], 0  ;;  %s790_s0 = inlined_call_operand.vmem [shape: f32[2,16,8], index: 0, kind: input, shape index: {}]   ;;  %s791_s1 = inlined_call_operand.vmem [shape: f32[16,16], index: 1, kind: input, shape index: {}]   ;;  %s792_s2 = inlined_call_operand.hbm [shape: f32[8,32], index: 2, kind: input, shape index: {}]   ;;  %s793_s3 = inlined_call_operand.vmem [shape: f32[1,32], index: 3, kind: input, shape index: {}]   ;;  %s794_s4 = inlined_call_operand.vmem [shape: f32[3,32], index: 4, kind: input, shape index: {}]   ;;  %s795_s5 = inlined_call_operand.hbm [shape: f32[1,2], index: 5, kind: input, shape index: {}]   ;;  %s796_s6 = inlined_call_operand.vmem [shape: f32[32,32], index: 6, kind: input, shape index: {}]   ;;  %s797_s7 = inlined_call_operand.hbm [shape: f32[2,16,32], index: 7, kind: output, shape index: {0}]   ;;  %s798_s8 = inlined_call_operand.hbm [shape: f32[2,1,16], index: 8, kind: output, shape index: {1}]  }
   0x1   :  { %15 = vsyncpa [#allocation6], 0 }
   0x2   :  { %16 = vsyncpa [#allocation4], 0 }
   0x3   :  { %17 = vsyncpa [#allocation9], 0  ;;  %s27_s29 = sshll.u32 %s792_s2, 4  ;;  %s623_s30 = smov [#allocation2]   ;;  %s28_s29 = int_to_ptr.hbm [resolvable:$true] %s27_s29 }
   0x4   :  { %s29_s9 = sshll.u32 %s623_s30, 4  ;;  %s42_s12 = sshll.u32 %s795_s5, 4  ;;  %s30_s9 = int_to_ptr.vmem [resolvable:$true] %s29_s9  ;;  %s43_s12 = int_to_ptr.hbm [resolvable:$true] %s42_s12 }
   0x5   :  { %32 = dma.hbm_to_vmem [thread:$0]  %s28_s29, 128, %s30_s9, [#allocation3]  }
   0x6   :  { %s624_s13 = smov [#allocation5]  }
   0x7   :  { %s44_s14 = sshll.u32 %s624_s13, 4  ;;  %s45_s14 = int_to_ptr.vmem [resolvable:$true] %s44_s14 }
   0x8   :  { %47 = dma.hbm_to_vmem [thread:$0]  %s43_s12, 16, %s45_s14, [#allocation6]  }
   0x9   :  { %615 = dma.done.wait [#allocation3], 128  }
   0xa   :  { %616 = vsyncadd [#allocation3], 4294967168 }
   0xb   :  { %617 = dma.done.wait [#allocation6], 16  }
   0xc   :  { %618 = vsyncadd [#allocation6], 4294967280  ;;  %vm67_vm0 = vcmask 64512   ;;  %v62_v0 = vld [vmem:[#allocation2] sm:$0xff]  ;;  %v59_v2 = vld [vmem:[%s790_s0 + $0x8] sm:$0xff]  ;;  %vm118_vm1 = vcmask 261120   ;;  %v179_v44 = vlaneseq }
   0xd   :  { %v58_v1 = vld [vmem:[%s790_s0] sm:$0xff]  ;;  %95 = vmatpush.msra.mxu0 %v62_v0  ;;  %v60_v3 = vld [vmem:[%s790_s0 + $0x10] sm:$0xff]  ;;  %v61_v4 = vld [vmem:[%s790_s0 + $0x18] sm:$0xff]  ;;  %v625_v32 = vmov 0   ;;  %vm184_vm2 = vcmask 130112   ;;  %vm237_vm5 = vcmask 130048  }
   0xe   :  { %467 = vmatmul.msk.f32.vlgmr.msra.gmra.mxu0 %vm67_vm0, %v58_v1  ;;  %v498_v5 = vld [vmem:[%s793_s3] ss:$0 sm:$0xff]  ;;  %v499_v6 = vld [vmem:[%s794_s4 + $0x1] ss:$0 sm:$0xff]  ;;  %493 = vset.pattern.permute.xlu0 %v625_v32  ;;  %v713_v33 = vld [vmem:[#allocation5] ss:$0 sm:$0xff] }
   0xf   :  { %v500_v7 = vld [vmem:[%s794_s4] ss:$0 sm:$0xff]  ;;  %494 = vset.pattern.permute.xlu1 %v625_v32  ;;  %495 = vset.pattern.permute.xlu2 %v625_v32  ;;  %v719_v45 = vand.u32 127, %v179_v44  ;;  %s435_s5 = sshll.u32 %s797_s7, 4  ;;  %s628_s17 = smov [#allocation8]   ;;  %vm426_vm10 = vcmask 122880   ;;  %s436_s5 = int_to_ptr.hbm [resolvable:$true] %s435_s5 }
  0x10   :  { %v225_v53 = vld [vmem:[%s791_s1] sm:$0xff]  ;;  %s446_s18 = sshll.u32 %s628_s17, 4  ;;  %s448_s21 = sshll.u32 %s798_s8, 4  ;;  %s447_s18 = int_to_ptr.vmem [resolvable:$true] %s446_s18  ;;  %s449_s21 = int_to_ptr.hbm [resolvable:$true] %s448_s21 }
  0x11   :  { %v722_v48 = vadd.s32 4294967288, %v719_v45  ;;  %vm227_vm4 = vcmp.eq.f32.partialorder %v225_v53, 0.0  ;;  %s629_s7 = smov 128   ;;  %s630_s8 = smov 8  }
  0x12   :  { %s631_s22 = smov 16   ;;  %s632_s23 = smov 1  }
  0x16   :  { %468 = vmatmul.msk.f32.gmra.mxu0 %vm67_vm0, %v59_v2 }
  0x1e   :  { %469 = vmatmul.msk.f32.gmra.mxu0 %vm67_vm0, %v60_v3 }
  0x26   :  { %470 = vmatmul.msk.f32.gmra.mxu0 %vm67_vm0, %v61_v4 }
  0x8b   :  { %v97_v8 = vpop.f32.mrf.mxu0 }
  0x8c   :  { %v98_v9 = vadd.f32 %v498_v5, %v97_v8 }
  0x8e   :  { %v139_v10 = vmul.f32 %v499_v6, %v98_v9  ;;  %v114_v11 = vmul.f32 %v500_v7, %v98_v9 }
  0x90   :  { %v143_v12 = vsel %vm118_vm1, %v139_v10, 0.0  ;;  %v119_v13 = vsel %vm118_vm1, %v114_v11, 0.0 }
  0x91   :  { %144 = vadd.xlane.f32.xlu2 %v143_v12  ;;  %120 = vadd.xlane.f32.xlu0 %v119_v13 }
  0x93   :  { %v100_v14 = vpop.f32.mrf.mxu0 }
  0x94   :  { %v101_v15 = vadd.f32 %v498_v5, %v100_v14 }
  0x96   :  { %302 = vmatpush.msra.mxu1 %v101_v15  ;;  %v140_v16 = vmul.f32 %v499_v6, %v101_v15  ;;  %v115_v17 = vmul.f32 %v500_v7, %v101_v15 }
  0x98   :  { %303 = vmatpush.msra.mxu1 %v98_v9  ;;  %v146_v18 = vsel %vm118_vm1, %v140_v16, 0.0  ;;  %v122_v19 = vsel %vm118_vm1, %v115_v17, 0.0 }
  0x99   :  { %147 = vadd.xlane.f32.xlu2 %v146_v18  ;;  %123 = vadd.xlane.f32.xlu0 %v122_v19 }
  0x9b   :  { %v103_v20 = vpop.f32.mrf.mxu0 }
  0x9c   :  { %v104_v21 = vadd.f32 %v498_v5, %v103_v20 }
  0x9e   :  { %v116_v22 = vmul.f32 %v500_v7, %v104_v21  ;;  %v141_v30 = vmul.f32 %v499_v6, %v104_v21 }
  0xa0   :  { %v125_v23 = vsel %vm118_vm1, %v116_v22, 0.0  ;;  %v149_v31 = vsel %vm118_vm1, %v141_v30, 0.0 }
  0xa1   :  { %126 = vadd.xlane.f32.xlu1 %v125_v23 }
  0xa3   :  { %v106_v24 = vpop.f32.mrf.mxu0 }
  0xa4   :  { %v107_v25 = vadd.f32 %v498_v5, %v106_v24 }
  0xa6   :  { %v117_v26 = vmul.f32 %v500_v7, %v107_v25  ;;  %331 = vmatpush.msra.mxu2 %v107_v25  ;;  %v142_v27 = vmul.f32 %v499_v6, %v107_v25  ;;  %v226_v6 = vld [vmem:[%s791_s1 + $0x8] sm:$0xff] }
  0xa7   :  { %vm228_vm8 = vcmp.eq.f32.partialorder %v226_v6, 0.0 }
  0xa8   :  { %v128_v28 = vsel %vm118_vm1, %v117_v26, 0.0  ;;  %332 = vmatpush.msra.mxu2 %v104_v21  ;;  %v152_v29 = vsel %vm118_vm1, %v142_v27, 0.0 }
  0xa9   :  { %129 = vadd.xlane.f32.xlu1 %v128_v28  ;;  %153 = vadd.xlane.f32.xlu2 %v152_v29 }
  0xb1   :  { %150 = vadd.xlane.f32.xlu1 %v149_v31 }
 0x104   :  { %v121_v34 = vpop.xlane.xlu0 %120  ;;  %v145_v42 = vpop.xlane.xlu2 %144 }
 0x105   :  { %v134_v35 = vadd.f32 %v713_v33, %v121_v34  ;;  %v181_v58 = vperm.slane %v145_v42, %v719_v45 }
 0x107   :  { %157 = vperm.xlu0 %493, %v134_v35  }
 0x10c   :  { %v124_v36 = vpop.xlane.xlu0 %123  ;;  %v148_v43 = vpop.xlane.xlu2 %147 }
 0x10d   :  { %v135_v37 = vadd.f32 %v713_v33, %v124_v36  ;;  %v183_v56 = vperm.slane %v148_v43, %v722_v48 }
 0x10f   :  { %162 = vperm.xlu1 %494, %v135_v37   ;;  %v185_v62 = vsel %vm184_vm2, %v183_v56, %v181_v58  ;;  %v502_v56 = vld [vmem:[%s794_s4 + $0x2] ss:$0 sm:$0xff]  ;;  %s627_s4 = smov [#allocation7]  }
 0x114   :  { %v127_v38 = vpop.xlane.xlu1 %126 }
 0x115   :  { %v136_v39 = vadd.f32 %v713_v33, %v127_v38  ;;  %v343_v38 = vld [vmem:[%s796_s6 + $0x18] sm:$0xff] }
 0x116   :  { %368 = vmatpush.msrb.mxu1 %v343_v38  ;;  %479 = vmatpush.msra.mxu3 %v343_v38 }
 0x117   :  { %167 = vperm.xlu2 %495, %v136_v39   ;;  %v342_v39 = vld [vmem:[%s796_s6 + $0x10] sm:$0xff] }
 0x118   :  { %369 = vmatpush.msrb.mxu1 %v342_v39  ;;  %480 = vmatpush.msra.mxu3 %v342_v39 }
 0x11c   :  { %v130_v40 = vpop.xlane.xlu1 %129  ;;  %v154_v46 = vpop.xlane.xlu2 %153 }
 0x11d   :  { %v137_v41 = vadd.f32 %v713_v33, %v130_v40  ;;  %v187_v50 = vperm.slane %v154_v46, %v722_v48 }
 0x11f   :  { %172 = vperm.xlu2 %495, %v137_v41  }
 0x124   :  { %v151_v47 = vpop.xlane.xlu1 %150 }
 0x125   :  { %v186_v49 = vperm.slane %v151_v47, %v719_v45 }
 0x127   :  { %v188_v51 = vsel %vm184_vm2, %v187_v50, %v186_v49 }
 0x171   :  { %v168_v52 = vpop.permute.xlu2 %167 }
 0x172   :  { %v211_v54 = vadd.f32 %v188_v51, %v168_v52 }
 0x174   :  { %v219_v55 = vmul.f32 0.01, %v211_v54  ;;  %vm215_vm3 = vcmp.ge.f32.partialorder %v211_v54, 0.0 }
 0x176   :  { %v223_v57 = vsel %vm215_vm3, %v211_v54, %v219_v55  ;;  %v341_v54 = vld [vmem:[%s796_s6 + $0x8] sm:$0xff]  ;;  %v340_v55 = vld [vmem:[%s796_s6] sm:$0xff]  ;;  %s433_s6 = sshll.u32 %s627_s4, 4  ;;  %s434_s6 = int_to_ptr.vmem [resolvable:$true] %s433_s6 }
 0x177   :  { %v235_v59 = vsel %vm227_vm4, -1e+09, %v223_v57  ;;  %370 = vmatpush.msrb.mxu1 %v341_v54  ;;  %481 = vmatpush.msra.mxu3 %v341_v54  ;;  %v626_v57 = vmov 1  }
 0x178   :  { %v244_v60 = vsel %vm237_vm5, %v235_v59, -inf  ;;  %496 = vset.pattern.permute.xlu1 %v626_v57  ;;  %497 = vset.pattern.permute.xlu0 %v626_v57 }
 0x179   :  { %245 = vmax.xlane.f32.xlu2 %v244_v60  ;;  %v173_v61 = vpop.permute.xlu2 %172  ;;  %v158_v63 = vpop.permute.xlu0 %157  ;;  %371 = vmatpush.msrb.mxu1 %v340_v55 }
 0x17a   :  { %v212_v0 = vadd.f32 %v188_v51, %v173_v61  ;;  %v209_v1 = vadd.f32 %v185_v62, %v158_v63  ;;  %482 = vmatpush.msra.mxu3 %v340_v55 }
 0x17c   :  { %v217_v2 = vmul.f32 0.01, %v209_v1  ;;  %vm213_vm6 = vcmp.ge.f32.partialorder %v209_v1, 0.0  ;;  %v220_v3 = vmul.f32 0.01, %v212_v0  ;;  %vm216_vm7 = vcmp.ge.f32.partialorder %v212_v0, 0.0 }
 0x17e   :  { %v221_v4 = vsel %vm213_vm6, %v209_v1, %v217_v2  ;;  %v224_v10 = vsel %vm216_vm7, %v212_v0, %v220_v3 }
 0x17f   :  { %v233_v5 = vsel %vm227_vm4, -1e+09, %v221_v4  ;;  %v236_v12 = vsel %vm228_vm8, -1e+09, %v224_v10 }
 0x180   :  { %v238_v7 = vsel %vm237_vm5, %v233_v5, -inf  ;;  %v247_v16 = vsel %vm237_vm5, %v236_v12, -inf }
 0x181   :  { %v163_v8 = vpop.permute.xlu1 %162  ;;  %239 = vmax.xlane.f32.xlu1 %v238_v7 }
 0x182   :  { %v210_v9 = vadd.f32 %v185_v62, %v163_v8 }
 0x184   :  { %v218_v11 = vmul.f32 0.01, %v210_v9  ;;  %vm214_vm9 = vcmp.ge.f32.partialorder %v210_v9, 0.0 }
 0x186   :  { %v222_v13 = vsel %vm214_vm9, %v210_v9, %v218_v11 }
 0x187   :  { %v234_v14 = vsel %vm228_vm8, -1e+09, %v222_v13 }
 0x188   :  { %v241_v15 = vsel %vm237_vm5, %v234_v14, -inf }
 0x189   :  { %242 = vmax.xlane.f32.xlu0 %v241_v15  ;;  %248 = vmax.xlane.f32.xlu1 %v247_v16 }
 0x1ec   :  { %v246_v17 = vpop.xlane.xlu2 %245 }
 0x1ed   :  { %v252_v18 = vsub.f32 %v235_v59, %v246_v17 }
 0x1ef   :  { %v258_v19 = vmul.f32 1.442695, %v252_v18 }
 0x1f1   :  { %503 = vpow2.f32 %v258_v19 }
 0x1f4   :  { %v240_v20 = vpop.xlane.xlu1 %239 }
 0x1f5   :  { %v250_v21 = vsub.f32 %v233_v5, %v240_v20 }
 0x1f7   :  { %v504_v22 = vpop.eup %503  ;;  %v254_v23 = vmul.f32 1.442695, %v250_v21 }
 0x1f8   :  { %v268_v24 = vsel %vm237_vm5, %v504_v22, 0.0 }
 0x1f9   :  { %505 = vpow2.f32 %v254_v23  ;;  %269 = vadd.xlane.f32.xlu1 %v268_v24 }
 0x1fc   :  { %v249_v25 = vpop.xlane.xlu1 %248  ;;  %v243_v26 = vpop.xlane.xlu0 %242 }
 0x1fd   :  { %v253_v27 = vsub.f32 %v236_v12, %v249_v25  ;;  %v251_v28 = vsub.f32 %v234_v14, %v243_v26 }
 0x1ff   :  { %v506_v29 = vpop.eup %505  ;;  %v260_v30 = vmul.f32 1.442695, %v253_v27  ;;  %v256_v31 = vmul.f32 1.442695, %v251_v28 }
 0x200   :  { %v262_v32 = vsel %vm237_vm5, %v506_v29, 0.0 }
 0x201   :  { %507 = vpow2.f32 %v260_v30  ;;  %263 = vadd.xlane.f32.xlu2 %v262_v32 }
 0x202   :  { %509 = vpow2.f32 %v256_v31 }
 0x207   :  { %v508_v34 = vpop.eup %507 }
 0x208   :  { %v510_v35 = vpop.eup %509  ;;  %v271_v36 = vsel %vm237_vm5, %v508_v34, 0.0 }
 0x209   :  { %272 = vadd.xlane.f32.xlu2 %v271_v36  ;;  %v265_v37 = vsel %vm237_vm5, %v510_v35, 0.0 }
 0x20a   :  { %266 = vadd.xlane.f32.xlu0 %v265_v37 }
 0x26c   :  { %v270_v40 = vpop.xlane.xlu1 %269 }
 0x26d   :  { %511 = vrcp.f32 %v270_v40 }
 0x273   :  { %v512_v41 = vpop.eup %511 }
 0x274   :  { %v264_v42 = vpop.xlane.xlu2 %263  ;;  %v280_v43 = vmul.f32 %v512_v41, %v504_v22 }
 0x275   :  { %513 = vrcp.f32 %v264_v42 }
 0x276   :  { %473 = vmatmul.msk.f32.vlgmr.msra.gmra.mxu2 %vm237_vm5, %v280_v43 }
 0x27b   :  { %v514_v44 = vpop.eup %513 }
 0x27c   :  { %v273_v46 = vpop.xlane.xlu2 %272  ;;  %v278_v47 = vmul.f32 %v514_v44, %v506_v29 }
 0x27d   :  { %515 = vrcp.f32 %v273_v46  ;;  %v267_v49 = vpop.xlane.xlu0 %266 }
 0x27e   :  { %517 = vrcp.f32 %v267_v49  ;;  %471 = vmatmul.msk.f32.vlgmr.msra.gmra.mxu1 %vm237_vm5, %v278_v47 }
 0x283   :  { %v516_v50 = vpop.eup %515 }
 0x284   :  { %v518_v51 = vpop.eup %517  ;;  %v281_v52 = vmul.f32 %v516_v50, %v508_v34 }
 0x285   :  { %v279_v53 = vmul.f32 %v518_v51, %v510_v35 }
 0x286   :  { %474 = vmatmul.msk.f32.gmra.mxu2 %vm237_vm5, %v281_v52 }
 0x287   :  { %472 = vmatmul.msk.f32.gmra.mxu1 %vm237_vm5, %v279_v53 }
 0x2f9   :  { %v334_v58 = vpop.f32.mrf.mxu2 }
 0x2fa   :  { %v392_v59 = vmul.f32 %v502_v56, %v334_v58 }
 0x2fb   :  { %v305_v60 = vpop.f32.mrf.mxu1 }
 0x2fc   :  { %v390_v61 = vmul.f32 %v502_v56, %v305_v60  ;;  %475 = vmatmul.msk.f32.vlgmr.msrb.gmra.mxu1 %vm118_vm1, %v305_v60  ;;  %v400_v62 = vsel %vm118_vm1, %v392_v59, 0.0 }
 0x2fd   :  { %401 = vadd.xlane.f32.xlu2 %v400_v62 }
 0x2fe   :  { %v394_v63 = vsel %vm118_vm1, %v390_v61, 0.0 }
 0x2ff   :  { %395 = vadd.xlane.f32.xlu0 %v394_v63 }
 0x304   :  { %v308_v0 = vpop.f32.mrf.mxu1 }
 0x305   :  { %v391_v1 = vmul.f32 %v502_v56, %v308_v0  ;;  %476 = vmatmul.msk.f32.vlgmr.msra.gmra.mxu3 %vm118_vm1, %v308_v0 }
 0x307   :  { %v397_v2 = vsel %vm118_vm1, %v391_v1, 0.0 }
 0x308   :  { %398 = vadd.xlane.f32.xlu1 %v397_v2 }
 0x309   :  { %v337_v3 = vpop.f32.mrf.mxu2 }
 0x30a   :  { %v393_v4 = vmul.f32 %v502_v56, %v337_v3 }
 0x30c   :  { %v403_v5 = vsel %vm118_vm1, %v393_v4, 0.0 }
 0x30d   :  { %477 = vmatmul.msk.f32.gmra.mxu3 %vm118_vm1, %v334_v58  ;;  %404 = vadd.xlane.f32.xlu0 %v403_v5 }
 0x315   :  { %478 = vmatmul.msk.f32.gmra.mxu3 %vm118_vm1, %v337_v3 }
 0x321   :  { %407 = vperm.xlu1 %496, %v713_v33  }
 0x370   :  { %v402_v11 = vpop.xlane.xlu2 %401 }
 0x372   :  { %v396_v8 = vpop.xlane.xlu0 %395 }
 0x379   :  { %v373_v6 = vpop.f32.mrf.mxu1 }
 0x37a   :  { %385 = vst.msk [vmem:[#allocation7] sm:$0xff] %vm118_vm1, %v373_v6 }
 0x37b   :  { %v399_v9 = vpop.xlane.xlu1 %398 }
 0x380   :  { %v405_v12 = vpop.xlane.xlu0 %404 }
 0x388   :  { %v376_v7 = vpop.f32.mrf.mxu3 }
 0x389   :  { %386 = vst.msk [vmem:[#allocation7 + $0x8] sm:$0xff] %vm118_vm1, %v376_v7 }
 0x390   :  { %v379_v10 = vpop.f32.mrf.mxu3 }
 0x391   :  { %387 = vst.msk [vmem:[#allocation7 + $0x10] sm:$0xff] %vm118_vm1, %v379_v10 }
 0x393   :  { %v408_v13 = vpop.permute.xlu1 %407 }
 0x394   :  { %v410_v33 = vadd.f32 %v408_v13, %v396_v8  ;;  %v411_v14 = vadd.f32 %v408_v13, %v399_v9  ;;  %v412_v15 = vadd.f32 %v408_v13, %v402_v11  ;;  %v413_v16 = vadd.f32 %v408_v13, %v405_v12 }
 0x396   :  { %v418_v17 = vperm.slane %v410_v33, %v719_v45  ;;  %v419_v18 = vperm.slane %v411_v14, %v722_v48  ;;  %v421_v19 = vperm.slane %v412_v15, %v719_v45  ;;  %v422_v20 = vperm.slane %v413_v16, %v722_v48 }
 0x398   :  { %v420_v21 = vsel %vm184_vm2, %v419_v18, %v418_v17  ;;  %v423_v22 = vsel %vm184_vm2, %v422_v20, %v421_v19  ;;  %v382_v23 = vpop.f32.mrf.mxu3 }
 0x399   :  { %388 = vst.msk [vmem:[#allocation7 + $0x18] sm:$0xff] %vm118_vm1, %v382_v23 }
 0x39a   :  { %441 = dma.vmem_to_hbm [thread:$0]  %s434_s6, 512, %s436_s5, [#allocation4], %s629_s7, %s629_s7, %s630_s8   ;;  %427 = vst.msk [vmem:[#allocation8] sm:$0x1] %vm426_vm10, %v420_v21 }
 0x39b   :  { %428 = vst.msk [vmem:[#allocation8 + $0x1] sm:$0x1] %vm426_vm10, %v423_v22 }
 0x39c   :  { %454 = dma.vmem_to_hbm [thread:$0]  %s447_s18, 32, %s449_s21, [#allocation9], %s631_s22, %s631_s22, %s632_s23  }
 0x39d   :  { %619 = dma.done.wait [#allocation4], 512  }
 0x39e   :  { %620 = vsyncadd [#allocation4], 4294966784 }
 0x39f   :  { %621 = dma.done.wait [#allocation9], 32  }
 0x3a0   :  { %622 = vsyncadd [#allocation9], 4294967264 }
 0x3a1   :  { %463 = vsyncpa [#allocation3], 1 }
 0x3a2   :  { %464 = vsyncpa [#allocation6], 1 }
 0x3a3   :  { %465 = vsyncpa [#allocation4], 1 }
 0x3a4   :  { %466 = vsyncpa [#allocation9], 1 }

</bundles_post_ra>
